<compile_context>
chip_gen: v7x
topology: tpu7x:2x2x1
jax: 0.10.0
libtpu: 0.0.40
codegen_flags: <defaults>
</compile_context>

<pallas_src>
import functools

import jax
import jax.numpy as jnp
from jax.experimental import pallas as pl
from jax.experimental.pallas import tpu as pltpu

H = 40  # hidden width of the MAML MLP


def mlp_kernel(x_ref, w1_ref, b1_ref, w2_ref, b2_ref, w3_ref, b3_ref, o_ref):
    x = x_ref[...]                                              # [1, TB]
    # Layer 1: Linear(1 -> 40) + ReLU.  K=1 contraction -> pure VPU broadcast
    # multiply (outer product) instead of a nearly-empty MXU pass.
    h1 = jnp.maximum(w1_ref[...] * x + b1_ref[...], 0.0)        # [40, TB]
    # Layer 2: Linear(40 -> 40) + ReLU on the MXU, lane-dense activations.
    h2 = jnp.dot(w2_ref[...], h1, preferred_element_type=jnp.float32)
    h2 = jnp.maximum(h2 + b2_ref[...], 0.0)                     # [40, TB]
    # Layer 3: Linear(40 -> 1): [1,40] @ [40,TB] -> [1,TB] (lane-dense output).
    out = jnp.dot(w3_ref[...], h2, preferred_element_type=jnp.float32)
    o_ref[...] = (out + b3_ref[...]).astype(o_ref.dtype)        # unmasked vst


@functools.partial(jax.jit, static_argnames=("tile_b",))
def maml_forward(x, w1, b1, w2, b2, w3, b3, *, tile_b=512):
    """Forward pass of MAMLModel.

    x:  [B, 1] float32
    w1: [40, 1], b1: [40]   (PyTorch Linear layout: [out, in], [out])
    w2: [40, 40], b2: [40]
    w3: [1, 40],  b3: [1]
    returns [B, 1] float32
    """
    B = x.shape[0]
    tb = max(128, (tile_b // 128) * 128)     # lane-aligned batch tile
    n_tiles = pl.cdiv(B, tb)
    Bp = n_tiles * tb

    # Batch -> lane axis. x is a [B, 1] column, so the transpose is a reshape.
    x_l = jnp.reshape(x, (1, B))
    if Bp != B:
        x_l = jnp.pad(x_l, ((0, 0), (0, Bp - B)))

    # Biases as [out, 1] columns so they broadcast along lanes inside the kernel.
    b1c = jnp.reshape(b1, (H, 1))
    b2c = jnp.reshape(b2, (H, 1))
    b3c = jnp.reshape(b3, (1, 1))

    const = lambda i: (0, 0)  # weights/biases: one block, VMEM-resident across the grid
    out_l = pl.pallas_call(
        mlp_kernel,
        out_shape=jax.ShapeDtypeStruct((1, Bp), jnp.float32),
        grid=(n_tiles,),
        in_specs=[
            pl.BlockSpec((1, tb), lambda i: (0, i)),   # x tile, lane-dense
            pl.BlockSpec((H, 1), const),               # w1
            pl.BlockSpec((H, 1), const),               # b1
            pl.BlockSpec((H, H), const),               # w2
            pl.BlockSpec((H, 1), const),               # b2
            pl.BlockSpec((1, H), const),               # w3
            pl.BlockSpec((1, 1), const),               # b3
        ],
        out_specs=pl.BlockSpec((1, tb), lambda i: (0, i)),
        compiler_params=pltpu.CompilerParams(
            dimension_semantics=("parallel",),         # megacore-shard the batch on v7x
        ),
    )(x_l, w1, b1c, w2, b2c, w3, b3c)

    return jnp.reshape(out_l[:, :B], (B, 1))


def init_params(key):
    """PyTorch-style Linear init: uniform(+-1/sqrt(fan_in)), [out, in] weights."""
    k1, k2, k3, k4, k5, k6 = jax.random.split(key, 6)

    def unif(k, shape, fan_in):
        bound = 1.0 / (fan_in ** 0.5)
        return jax.random.uniform(k, shape, jnp.float32, -bound, bound)

    w1 = unif(k1, (H, 1), 1)
    b1 = unif(k2, (H,), 1)
    w2 = unif(k3, (H, H), H)
    b2 = unif(k4, (H,), H)
    w3 = unif(k5, (1, H), H)
    b3 = unif(k6, (1,), H)
    return w1, b1, w2, b2, w3, b3


def reference_forward(x, w1, b1, w2, b2, w3, b3):
    h1 = jnp.maximum(x @ w1.T + b1, 0.0)
    h2 = jnp.maximum(h1 @ w2.T + b2, 0.0)
    return h2 @ w3.T + b3


if __name__ == "__main__":
    key = jax.random.PRNGKey(0)
    kx, kp = jax.random.split(key)

    # Small-but-tiled test: B=300 is not a multiple of the tile, so the wrapper's
    # padding and the 3-step batch grid are both exercised.
    B = 300
    x = jax.random.normal(kx, (B, 1), dtype=jnp.float32)
    params = init_params(kp)

    out = maml_forward(x, *params, tile_b=128)
    out = jax.block_until_ready(out)

    ref = reference_forward(x, *params)
    assert out.shape == (B, 1)
    assert jnp.allclose(out, ref, atol=1e-5, rtol=1e-5), "mismatch vs JAX reference"

    # TODO(synk): for end-to-end MAML, fuse the K inner-loop adaptation steps
    # (forward + backward + SGD) into one kernel with weights held in VMEM scratch.
    print("KERNEL_OK")
</pallas_src>

<mosaic_0001>
module attributes {stable_mosaic.version = 11 : i64} {
  func.func @mlp_kernel(%arg0: i32, %arg1: memref<1x128xf32, #tpu.memory_space<vmem>>, %arg2: memref<40x1xf32, #tpu.memory_space<vmem>>, %arg3: memref<40x1xf32, #tpu.memory_space<vmem>>, %arg4: memref<40x40xf32, #tpu.memory_space<vmem>>, %arg5: memref<40x1xf32, #tpu.memory_space<vmem>>, %arg6: memref<1x40xf32, #tpu.memory_space<vmem>>, %arg7: memref<1x1xf32, #tpu.memory_space<vmem>>, %arg8: memref<1x128xf32, #tpu.memory_space<vmem>>) attributes {dimension_semantics = [#tpu.dimension_semantics<parallel>], iteration_bounds = array<i64: 3>, scalar_prefetch = 0 : i64, scratch_operands = 0 : i64, tpu.core_type = #tpu.core_type<tc>, window_params = [{transform_indices = @transform_0, window_bounds = array<i64: 1, 128>}, {pipeline_mode = #tpu.pipeline_mode<synchronous>, transform_indices = @transform_1, window_bounds = array<i64: 40, 1>}, {pipeline_mode = #tpu.pipeline_mode<synchronous>, transform_indices = @transform_2, window_bounds = array<i64: 40, 1>}, {pipeline_mode = #tpu.pipeline_mode<synchronous>, transform_indices = @transform_3, window_bounds = array<i64: 40, 40>}, {pipeline_mode = #tpu.pipeline_mode<synchronous>, transform_indices = @transform_4, window_bounds = array<i64: 40, 1>}, {pipeline_mode = #tpu.pipeline_mode<synchronous>, transform_indices = @transform_5, window_bounds = array<i64: 1, 40>}, {pipeline_mode = #tpu.pipeline_mode<synchronous>, transform_indices = @transform_6, window_bounds = array<i64: 1, 1>}, {transform_indices = @transform_7, window_bounds = array<i64: 1, 128>}]} {
    %c0 = arith.constant 0 : index
    %c0_0 = arith.constant 0 : index
    %0 = vector.load %arg1[%c0, %c0_0] : memref<1x128xf32, #tpu.memory_space<vmem>>, vector<1x128xf32>
    %c0_1 = arith.constant 0 : index
    %c0_2 = arith.constant 0 : index
    %1 = vector.load %arg2[%c0_1, %c0_2] : memref<40x1xf32, #tpu.memory_space<vmem>>, vector<40x1xf32>
    %2 = vector.broadcast %1 : vector<40x1xf32> to vector<40x128xf32>
    %3 = vector.broadcast %0 : vector<1x128xf32> to vector<40x128xf32>
    %4 = arith.mulf %2, %3 : vector<40x128xf32>
    %c0_3 = arith.constant 0 : index
    %c0_4 = arith.constant 0 : index
    %5 = vector.load %arg3[%c0_3, %c0_4] : memref<40x1xf32, #tpu.memory_space<vmem>>, vector<40x1xf32>
    %6 = vector.broadcast %5 : vector<40x1xf32> to vector<40x128xf32>
    %7 = arith.addf %4, %6 : vector<40x128xf32>
    %cst = arith.constant 0.000000e+00 : f32
    %8 = vector.broadcast %cst : f32 to vector<40x128xf32>
    %9 = arith.maximumf %7, %8 : vector<40x128xf32>
    %c0_5 = arith.constant 0 : index
    %c0_6 = arith.constant 0 : index
    %10 = vector.load %arg4[%c0_5, %c0_6] : memref<40x40xf32, #tpu.memory_space<vmem>>, vector<40x40xf32>
    %cst_7 = arith.constant dense<0.000000e+00> : vector<40x128xf32>
    %11 = tpu.matmul %10, %9, %cst_7 {dimension_numbers = #tpu.dot_dimension_numbers<[1], [0], [0], [1], [0, 0, 1, 1], [], []>} : vector<40x40xf32>, vector<40x128xf32>, vector<40x128xf32> -> vector<40x128xf32>
    %c0_8 = arith.constant 0 : index
    %c0_9 = arith.constant 0 : index
    %12 = vector.load %arg5[%c0_8, %c0_9] : memref<40x1xf32, #tpu.memory_space<vmem>>, vector<40x1xf32>
    %13 = vector.broadcast %12 : vector<40x1xf32> to vector<40x128xf32>
    %14 = arith.addf %11, %13 : vector<40x128xf32>
    %cst_10 = arith.constant 0.000000e+00 : f32
    %15 = vector.broadcast %cst_10 : f32 to vector<40x128xf32>
    %16 = arith.maximumf %14, %15 : vector<40x128xf32>
    %c0_11 = arith.constant 0 : index
    %c0_12 = arith.constant 0 : index
    %17 = vector.load %arg6[%c0_11, %c0_12] : memref<1x40xf32, #tpu.memory_space<vmem>>, vector<1x40xf32>
    %cst_13 = arith.constant dense<0.000000e+00> : vector<1x128xf32>
    %18 = tpu.matmul %17, %16, %cst_13 {dimension_numbers = #tpu.dot_dimension_numbers<[1], [0], [0], [1], [0, 0, 1, 1], [], []>} : vector<1x40xf32>, vector<40x128xf32>, vector<1x128xf32> -> vector<1x128xf32>
    %c0_14 = arith.constant 0 : index
    %c0_15 = arith.constant 0 : index
    %19 = vector.load %arg7[%c0_14, %c0_15] : memref<1x1xf32, #tpu.memory_space<vmem>>, vector<1x1xf32>
    %20 = vector.broadcast %19 : vector<1x1xf32> to vector<1x128xf32>
    %21 = arith.addf %18, %20 : vector<1x128xf32>
    %c0_16 = arith.constant 0 : index
    %c0_17 = arith.constant 0 : index
    %22 = vector.load %arg8[%c0_16, %c0_17] : memref<1x128xf32, #tpu.memory_space<vmem>>, vector<1x128xf32>
    tpu.vector_store %arg8[%c0_16, %c0_17], %21 {strides = array<i32>} : memref<1x128xf32, #tpu.memory_space<vmem>>, vector<1x128xf32>,
    return
  }
  func.func @transform_0(%arg0: i32) -> (i32, i32) {
    %c0_i32 = arith.constant 0 : i32
    %c0_i32_0 = arith.constant 0 : i32
    return %c0_i32, %arg0 : i32, i32
  }
  func.func @transform_1(%arg0: i32) -> (i32, i32) {
    %c0_i32 = arith.constant 0 : i32
    %c0_i32_0 = arith.constant 0 : i32
    %c0_i32_1 = arith.constant 0 : i32
    return %c0_i32, %c0_i32_0 : i32, i32
  }
  func.func @transform_2(%arg0: i32) -> (i32, i32) {
    %c0_i32 = arith.constant 0 : i32
    %c0_i32_0 = arith.constant 0 : i32
    %c0_i32_1 = arith.constant 0 : i32
    return %c0_i32, %c0_i32_0 : i32, i32
  }
  func.func @transform_3(%arg0: i32) -> (i32, i32) {
    %c0_i32 = arith.constant 0 : i32
    %c0_i32_0 = arith.constant 0 : i32
    %c0_i32_1 = arith.constant 0 : i32
    return %c0_i32, %c0_i32_0 : i32, i32
  }
  func.func @transform_4(%arg0: i32) -> (i32, i32) {
    %c0_i32 = arith.constant 0 : i32
    %c0_i32_0 = arith.constant 0 : i32
    %c0_i32_1 = arith.constant 0 : i32
    return %c0_i32, %c0_i32_0 : i32, i32
  }
  func.func @transform_5(%arg0: i32) -> (i32, i32) {
    %c0_i32 = arith.constant 0 : i32
    %c0_i32_0 = arith.constant 0 : i32
    %c0_i32_1 = arith.constant 0 : i32
    return %c0_i32, %c0_i32_0 : i32, i32
  }
  func.func @transform_6(%arg0: i32) -> (i32, i32) {
    %c0_i32 = arith.constant 0 : i32
    %c0_i32_0 = arith.constant 0 : i32
    %c0_i32_1 = arith.constant 0 : i32
    return %c0_i32, %c0_i32_0 : i32, i32
  }
  func.func @transform_7(%arg0: i32) -> (i32, i32) {
    %c0_i32 = arith.constant 0 : i32
    %c0_i32_0 = arith.constant 0 : i32
    return %c0_i32, %arg0 : i32, i32
  }
}

</mosaic_0001>

<bundles_post_ra>
// kernel: maml_forward.1
= control target key start
LH: loop header
LB: loop body
LE: loop exit
PB: predicated region body
PF: predicated region fallthrough
CT: control target
= control target key end

     0   :  { %s777_s26 = smov 0   ;;  %s889_s0 = inlined_call_operand.vmem [shape: f32[1,384], index: 0, kind: input, shape index: {}]   ;;  %s890_s1 = inlined_call_operand.vmem [shape: f32[40,1], index: 1, kind: input, shape index: {}]   ;;  %s891_s2 = inlined_call_operand.vmem [shape: f32[40,1], index: 2, kind: input, shape index: {}]   ;;  %s892_s3 = inlined_call_operand.vmem [shape: f32[40,40], index: 3, kind: input, shape index: {}]   ;;  %s893_s4 = inlined_call_operand.vmem [shape: f32[40,1], index: 4, kind: input, shape index: {}]   ;;  %s894_s5 = inlined_call_operand.vmem [shape: f32[1,40], index: 5, kind: input, shape index: {}]   ;;  %s895_s6 = inlined_call_operand.<no memory space> [shape: f32[1,1], index: 6, kind: input, shape index: {}]   ;;  %s896_s7 = inlined_call_operand.vmem [shape: f32[1,384], index: 7, kind: output, shape index: {}]  }
   0x1   :  { %v12_v0 = vstv %s895_s6 }
   0x2   :  { %13 = vst [vmem:[#allocation2] sm:$0x1] %v12_v0 }
   0x3 LB: > { %s628_s27 = sadd.s32 4294967295, %s728_s26   ;;  %p632_p0 = scmp.ge.s32.totalorder %s728_s26, 1  ;;  %s728_s26 = sphi %s777_s26, %s19_s26  }
   0x4   : > { %p237_p1 = scmp.lt.s32.totalorder %s728_s26, 4 }
   0x6   : > { %p238_p2 = pnand %p632_p0, %p237_p1 }
   0x7   : > { %v313_v1 = vld [vmem:[%s891_s2] sm:$0xff] (!%p238_p2)  ;;  %v730_v3 = vmov (!%p238_p2), 0   ;;  %v314_v4 = vld [vmem:[%s891_s2 + $0x8] sm:$0xff] (!%p238_p2)  ;;  %v275_v6 = vld [vmem:[%s890_s1 + $0x18] sm:$0xff] (!%p238_p2)  ;;  %v731_v10 = vmov (!%p238_p2), 0.0|0.0   ;;  %vm732_vm0 = vmmov (!%p238_p2), 0  }
   0x8   : > { %241 = sbr.rel (%p238_p2) target bundleno = 610 (0x262), region = 48  ;;  %v272_v2 = vld [vmem:[%s890_s1] sm:$0xff] (!%p238_p2)  ;;  %721 = vset.pattern.permute.xlu1 (!%p238_p2), %v730_v3  ;;  %720 = vset.pattern.permute.xlu0 (!%p238_p2), %v730_v3  ;;  %v273_v5 = vld [vmem:[%s890_s1 + $0x8] sm:$0xff] (!%p238_p2)  ;;  %v274_v7 = vld [vmem:[%s890_s1 + $0x10] sm:$0xff] (!%p238_p2)  ;;  %v733_v17 = vmov (!%p238_p2), 0.0   ;;  %p265_p3 = scmp.lt.s32.totalorder (!%p238_p2), %s628_s27, 2 }
   0x9   : > { %320 = vperm.xlu1 (!%p238_p2), %721, %v313_v1   ;;  %279 = vperm.xlu0 (!%p238_p2), %720, %v272_v2   ;;  %v316_v8 = vld [vmem:[%s891_s2 + $0x18] sm:$0xff] (!%p238_p2)  ;;  %v315_v9 = vld [vmem:[%s891_s2 + $0x10] sm:$0xff] (!%p238_p2)  ;;  %v317_v11 = vld [vmem:[%s891_s2 + $0x20] sm:$0xff] (!%p238_p2)  ;;  %vm388_vm1 = vcmask (!%p238_p2), 326656  }
   0xa   : > { %696 = vmatprep.subr.bf16.mxu0 (!%p238_p2), %v731_v10  ;;  %702 = vmatprep.subr.bf16.mxu1 (!%p238_p2), %v731_v10  ;;  %v276_v12 = vld [vmem:[%s890_s1 + $0x20] sm:$0xff] (!%p238_p2)  ;;  %v359_v13 = vld [vmem:[%s893_s4 + $0x8] sm:$0xff] (!%p238_p2)  ;;  %v361_v15 = vld [vmem:[%s893_s4 + $0x18] sm:$0xff] (!%p238_p2) }
   0xb   : > { %v358_v14 = vld [vmem:[%s893_s4] sm:$0xff] (!%p238_p2)  ;;  %v360_v16 = vld [vmem:[%s893_s4 + $0x10] sm:$0xff] (!%p238_p2)  ;;  %668 = vmatprep.mubr.msk.f32.mxu0 (!%p238_p2), %vm732_vm0, %v733_v17  ;;  %693 = vmatprep.mubr.msk.f32.mxu1 (!%p238_p2), %vm732_vm0, %v733_v17  ;;  %v354_v49 = vld [vmem:[%s892_s3 + $0x8] sm:$0xff] (!%p238_p2) }
   0xc   : > { %v500_v18 = vld [vmem:[#allocation2] sm:$0x1] (!%p238_p2)  ;;  %v355_v50 = vld [vmem:[%s892_s3 + $0x10] sm:$0xff] (!%p238_p2)  ;;  %v356_v51 = vld [vmem:[%s892_s3 + $0x18] sm:$0xff] (!%p238_p2) }
   0xd   : > { %325 = vperm.xlu1 (!%p238_p2), %721, %v314_v4   ;;  %284 = vperm.xlu0 (!%p238_p2), %720, %v273_v5   ;;  %v362_v19 = vld [vmem:[%s893_s4 + $0x20] sm:$0xff] (!%p238_p2) }
   0xe   : > { %v353_v48 = vld [vmem:[%s892_s3] sm:$0xff] (!%p238_p2) }
   0xf   : > { %s898_s27 = smov (!%p265_p3, %s628_s27), 2  ;;  %v357_v52 = vld [vmem:[%s892_s3 + $0x20] sm:$0xff] }
  0x10   : > { %s267_s14 = scalar_lea.vmem %s889_s0, %s898_s27  ;;  %s270_s30 = scalar_lea.vmem %s896_s7, %s898_s27 }
  0x11   : > { %294 = vperm.xlu1 %721, %v275_v6   ;;  %289 = vperm.xlu0 %720, %v274_v7   ;;  %v633_v20 = vld [vmem:[%s267_s14] ss:$0 sm:$0xff] }
  0x15   : > { %335 = vperm.xlu1 %721, %v316_v8   ;;  %330 = vperm.xlu0 %720, %v315_v9  }
  0x19   : > { %340 = vperm.xlu1 %721, %v317_v11   ;;  %299 = vperm.xlu0 %720, %v276_v12  }
  0x1d   : > { %370 = vperm.xlu1 %721, %v359_v13   ;;  %365 = vperm.xlu0 %720, %v358_v14  }
  0x21   : > { %380 = vperm.xlu1 %721, %v361_v15   ;;  %375 = vperm.xlu0 %720, %v360_v16  }
  0x25   : > { %503 = vperm.xlu1 %721, %v500_v18   ;;  %385 = vperm.xlu0 %720, %v362_v19   ;;  %v499_v18 = vld [vmem:[%s894_s5] sm:$0x1] }
  0x88   : > { %v321_v21 = vpop.permute.xlu1 %320  ;;  %v280_v22 = vpop.permute.xlu0 %279 }
  0x89   : > { %v308_v23 = vmul.f32 %v633_v20, %v280_v22 }
  0x8b   : > { %v343_v26 = vadd.f32 %v321_v21, %v308_v23 }
  0x8c   : > { %v326_v24 = vpop.permute.xlu1 %325  ;;  %v285_v25 = vpop.permute.xlu0 %284 }
  0x8d   : > { %v309_v27 = vmul.f32 %v633_v20, %v285_v25  ;;  %v348_v31 = vmax.f32 %v343_v26, 0.0 }
  0x8f   : > { %v344_v28 = vadd.f32 %v326_v24, %v309_v27 }
  0x90   : > { %v295_v29 = vpop.permute.xlu1 %294  ;;  %v290_v30 = vpop.permute.xlu0 %289 }
  0x91   : > { %v349_v32 = vmax.f32 %v344_v28, 0.0  ;;  %v311_v33 = vmul.f32 %v633_v20, %v295_v29  ;;  %v310_v34 = vmul.f32 %v633_v20, %v290_v30 }
  0x93   : > { %v697_v35 = vpack.c.bf16 %v349_v32, %v348_v31 }
  0x94   : > { %v336_v36 = vpop.permute.xlu1 %335  ;;  %v331_v37 = vpop.permute.xlu0 %330 }
  0x95   : > { %v346_v38 = vadd.f32 %v336_v36, %v311_v33  ;;  %v345_v39 = vadd.f32 %v331_v37, %v310_v34  ;;  %698 = vmatpush3.bf16.msra.mxu0 %v697_v35 }
  0x96   : > { %699 = vmatprep.subr.bf16.mxu0 %v731_v10 }
  0x97   : > { %v351_v40 = vmax.f32 %v346_v38, 0.0  ;;  %v350_v41 = vmax.f32 %v345_v39, 0.0 }
  0x98   : > { %v300_v42 = vpop.permute.xlu0 %299  ;;  %v341_v45 = vpop.permute.xlu1 %340 }
  0x99   : > { %v700_v43 = vpack.c.bf16 %v351_v40, %v350_v41  ;;  %v312_v44 = vmul.f32 %v633_v20, %v300_v42 }
  0x9b   : > { %v347_v46 = vadd.f32 %v341_v45, %v312_v44  ;;  %701 = vmatpush3.bf16.msra.mxu0 %v700_v43 }
  0x9c   : > { %666 = vmatprep.subr.mxu0 %v733_v17  ;;  %v366_v55 = vpop.permute.xlu0 %365  ;;  %v371_v57 = vpop.permute.xlu1 %370 }
  0x9d   : > { %v352_v47 = vmax.f32 %v347_v46, 0.0 }
  0x9f   : > { %667 = vmatpush3.msra.mxu0 %v352_v47 }
  0xa0   : > { %669 = vmatmul.mubr.msk.f32.vlgmr.msra.gmra.mrb[0].mxu0 %vm388_vm1, %v353_v48  ;;  %v376_v2 = vpop.permute.xlu0 %375  ;;  %v381_v4 = vpop.permute.xlu1 %380 }
  0xa1   : > { %671 = vmatprep.mubr.msk.f32.mxu0 %vm732_vm0, %v733_v17 }
  0xa4   : > { %672 = vmatmul.mubr.msk.f32.gmra.mrb[2].mxu0 %vm388_vm1, %v354_v49  ;;  %v386_v11 = vpop.permute.xlu0 %385  ;;  %v504_v21 = vpop.permute.xlu1 %503 }
  0xa5   : > { %674 = vmatprep.mubr.msk.f32.mxu0 %vm732_vm0, %v733_v17 }
  0xa8   : > { %675 = vmatmul.mubr.msk.f32.gmra.mrb[4].mxu0 %vm388_vm1, %v355_v50 }
  0xa9   : > { %677 = vmatprep.mubr.msk.f32.mxu0 %vm732_vm0, %v733_v17 }
  0xac   : > { %678 = vmatmul.mubr.msk.f32.gmra.mrb[6].mxu0 %vm388_vm1, %v356_v51 }
  0xad   : > { %680 = vmatprep.mubr.msk.f32.mxu0 %vm732_vm0, %v733_v17 }
  0xb0   : > { %681 = vmatmul.mubr.msk.f32.gmra.mrb[8].mxu0 %vm388_vm1, %v357_v52 }
 0x173   : > { %v470_v53 = vpop.f32.mrb[0].mxu0 }
 0x174   : > { %v670_v54 = vpop.f32.mrb[1].mxu0  ;;  %v471_v56 = vadd.f32 %v470_v53, %v366_v55 }
 0x176   : > { %v494_v61 = vmax.f32 %v471_v56, 0.0 }
 0x177   : > { %v475_v58 = vpop.f32.mrb[2].mxu0 }
 0x178   : > { %v476_v59 = vadd.f32 %v475_v58, %v371_v57  ;;  %v673_v60 = vpop.f32.mrb[3].mxu0 }
 0x17a   : > { %v495_v62 = vmax.f32 %v476_v59, 0.0 }
 0x17b   : > { %v480_v63 = vpop.f32.mrb[4].mxu0 }
 0x17c   : > { %v676_v0 = vpop.f32.mrb[5].mxu0  ;;  %v703_v1 = vpack.c.bf16 %v495_v62, %v494_v61  ;;  %v481_v3 = vadd.f32 %v480_v63, %v376_v2 }
 0x17e   : > { %704 = vmatpush3.bf16.msra.mxu1 %v703_v1  ;;  %v496_v8 = vmax.f32 %v481_v3, 0.0 }
 0x17f   : > { %v485_v5 = vpop.f32.mrb[6].mxu0  ;;  %705 = vmatprep.subr.bf16.mxu1 %v731_v10  ;;  %v506_v10 = vlaneseq }
 0x180   : > { %v486_v6 = vadd.f32 %v485_v5, %v381_v4  ;;  %v679_v7 = vpop.f32.mrb[7].mxu0 }
 0x181   : > { %v507_v19 = vshrl.u32 %v506_v10, 7 }
 0x182   : > { %v497_v9 = vmax.f32 %v486_v6, 0.0 }
 0x183   : > { %v490_v12 = vpop.f32.mrb[8].mxu0  ;;  %v508_v20 = vsub.s32 0, %v507_v19 }
 0x184   : > { %v706_v13 = vpack.c.bf16 %v497_v9, %v496_v8  ;;  %v491_v14 = vadd.f32 %v490_v12, %v386_v11  ;;  %v682_v15 = vpop.f32.mrb[9].mxu0 }
 0x185   : > { %v509_v22 = vrot.slane %v504_v21, %v508_v20 }
 0x186   : > { %707 = vmatpush3.bf16.msra.mxu1 %v706_v13  ;;  %v498_v16 = vmax.f32 %v491_v14, 0.0 }
 0x187   : > { %691 = vmatprep.subr.mxu1 %v733_v17 }
 0x18a   : > { %692 = vmatpush3.msra.mxu1 %v498_v16 }
 0x18b   : > { %694 = vmatmul.mubr.msk.f32.vlgmr.msra.gmra.mrb[0].mxu1 %vm388_vm1, %v499_v18 }
 0x25e   : > { %v579_v23 = vpop.f32.mrb[0].mxu1 }
 0x25f   : > { %v580_v24 = vadd.f32 %v579_v23, %v509_v22  ;;  %v695_v17 = vpop.f32.mrb[1].mxu1 }
 0x261   : > { %583 = vst [vmem:[%s270_s30] sm:$0x1] %v580_v24 }
 0x262 PF: > { %s19_s26 = sadd.s32 1, %s728_s26  }
 0x263   : > { %p16_p4 = scmp.ge.s32.totalorder %s19_s26, 5  }
 0x265   :  { %18 = sbr.rel (!%p16_p4) target bundleno = 3 (0x3), region = 78 }

</bundles_post_ra>
